<compile_context>
chip_gen: v7x
topology: tpu7x:2x2x1
jax: 0.10.0
libtpu: 0.0.40
codegen_flags: <defaults>
</compile_context>

<pallas_src>
import jax
import jax.numpy as jnp
from jax.experimental import pallas as pl
from jax.experimental.pallas import tpu as pltpu

LN_EPS = 1e-5


def _round_up(x, m):
    return ((x + m - 1) // m) * m


def _sublane_align(dtype):
    # sublane packing: 8 rows for 4-byte dtypes, 16 for 2-byte (bf16), 32 for 1-byte
    return max(8, 32 // jnp.dtype(dtype).itemsize)


def _vmem_capacity_bytes():
    """Physical VMEM per TensorCore (128 MiB v5e/v6e, 64 MiB v7x); conservative fallback."""
    try:
        info = pltpu.get_tpu_info()
        cap = getattr(info, "vmem_capacity_bytes", None)
        if cap:
            return int(cap)
    except Exception:
        pass
    return 64 * 1024 * 1024


def _choose_tiles(M, D1, D2, x_dtype, w_dtype, budget_bytes):
    """Pick (TM, TN) so the double-buffered working set fits the VMEM budget.

    TM is the FLOPs-per-streamed-weight-byte lever, so it starts high (cap 1024) and is
    the LAST thing to shrink.  TN floor is 256 (full N width of the 2x256x256 MXU) when
    D2 is large enough, else 128.
    """
    xb = jnp.dtype(x_dtype).itemsize
    wb = jnp.dtype(w_dtype).itemsize
    m_align = _sublane_align(x_dtype)

    def footprint(tm, tn):
        io = 2 * tm * D1 * xb + 2 * D1 * tn * wb + 2 * tm * tn * xb  # double-buffered tiles
        ln_scratch = tm * D1 * wb                                    # cached normalized rows
        temps = tm * D1 * 4 + tm * tn * 4                            # f32 LN temporaries + matmul acc
        return io + ln_scratch + temps

    tm = min(1024, _round_up(M, m_align))
    tn = min(512, _round_up(D2, 128))
    tn_floor = 256 if tn >= 256 else 128
    # Shrink the weight/output tile first, then the row tile, until we fit.
    while footprint(tm, tn) > budget_bytes and tn > tn_floor:
        tn = max(tn_floor, _round_up(tn // 2, 128))
    while footprint(tm, tn) > budget_bytes and tm > m_align:
        tm = max(m_align, _round_up(tm // 2, m_align))
    return tm, tn


def _ln_rows_f32(x32):
    # LayerNorm over the feature dim, no affine: biased variance, eps inside rsqrt,
    # stats always in f32 (matches torch.nn.LayerNorm(elementwise_affine=False)).
    mean = jnp.mean(x32, axis=-1, keepdims=True)
    xc = x32 - mean
    var = jnp.mean(xc * xc, axis=-1, keepdims=True)
    return xc * jax.lax.rsqrt(var + LN_EPS)


def ln_linear_kernel_cached(x_ref, wt_ref, o_ref, xn_ref):
    """Grid = (M-tiles, N-tiles).  LN hoisted out of the j loop via VMEM scratch."""
    @pl.when(pl.program_id(1) == 0)
    def _():
        xn_ref[...] = _ln_rows_f32(x_ref[...].astype(jnp.float32)).astype(xn_ref.dtype)
    # MXU matmul: operands in the weight dtype (bf16 fast path if applicable), f32 acc.
    y = jnp.dot(xn_ref[...], wt_ref[...], preferred_element_type=jnp.float32)
    o_ref[...] = y.astype(o_ref.dtype)


def ln_linear_kernel_stream_x(x_ref, wt_ref, o_ref):
    """Grid = (N-tiles, M-tiles): weight tile resident, x streamed; LN recomputed per
    step (cheap VPU/XLU work hidden under the MXU)."""
    xn = _ln_rows_f32(x_ref[...].astype(jnp.float32))
    w = wt_ref[...]
    y = jnp.dot(xn.astype(w.dtype), w, preferred_element_type=jnp.float32)
    o_ref[...] = y.astype(o_ref.dtype)


def ln_linear(x, wt, *, tm=None, tn=None, vmem_budget_bytes=None, grid_order=None):
    """LayerNorm(no affine) + Linear(no bias).

    x:  [M, D1]
    wt: [D1, D2]  -- the PyTorch Linear weight already transposed (W.T).  Pre-transpose
                     (and ideally store in bf16) ONCE at parameter-init time via
                     prepare_ln_linear_weight(); do NOT transpose per call.
    """
    M, D1 = x.shape
    D1w, D2 = wt.shape
    assert D1 == D1w, (D1, D1w)

    # Per-generation VMEM budget (≈3/4 of physical), explicit compiler limit just above it.
    vmem_cap = _vmem_capacity_bytes()
    if vmem_budget_bytes is None:
        vmem_budget_bytes = (vmem_cap * 3) // 4
    vmem_limit_bytes = int(max(32 << 20,
                               min(vmem_cap - (8 << 20), vmem_budget_bytes + (8 << 20))))

    m_align = _sublane_align(x.dtype)
    tm_auto, tn_auto = _choose_tiles(M, D1, D2, x.dtype, wt.dtype, vmem_budget_bytes)
    tm = tm_auto if tm is None else tm
    tn = tn_auto if tn is None else tn
    # Manual overrides must respect the (sublane-pack, 128) layout constraints.
    assert tm % m_align == 0, f"tm={tm} must be a multiple of {m_align} for {x.dtype}"
    assert tn % 128 == 0, f"tn={tn} must be a multiple of 128"

    # Pad rows to a multiple of TM and the output dim to a multiple of TN (lane-dense,
    # >=128-multiple stores).  D1 is never padded, so LN statistics are exact; padded
    # rows/columns are zeros and are sliced away below.
    Mp = _round_up(M, tm)
    D2p = _round_up(D2, tn)
    x_p = x if Mp == M else jnp.pad(x, ((0, Mp - M), (0, 0)))
    wt_p = wt if D2p == D2 else jnp.pad(wt, ((0, 0), (0, D2p - D2)))

    xb = jnp.dtype(x.dtype).itemsize
    wb = jnp.dtype(wt.dtype).itemsize
    nm, nn = Mp // tm, D2p // tn

    # Choose grid order from the operand re-fetch math (HBM traffic per order).
    if grid_order is None:
        bytes_x_resident = Mp * D1 * xb + nm * D1 * D2p * wb   # weight streamed nm times
        bytes_w_resident = nn * Mp * D1 * xb + D1 * D2p * wb   # x streamed nn times
        grid_order = "x_resident" if bytes_x_resident <= bytes_w_resident else "w_resident"

    out_bytes = Mp * D2p * xb
    flops = 2 * Mp * D1 * D2p + 6 * Mp * D1
    transcendentals = Mp  # one rsqrt per row

    if grid_order == "x_resident":
        bytes_accessed = Mp * D1 * xb + nm * D1 * D2p * wb + out_bytes
        out = pl.pallas_call(
            ln_linear_kernel_cached,
            out_shape=jax.ShapeDtypeStruct((Mp, D2p), x.dtype),
            grid_spec=pltpu.PrefetchScalarGridSpec(
                num_scalar_prefetch=0,
                grid=(nm, nn),
                in_specs=[
                    pl.BlockSpec((tm, D1), lambda i, j: (i, 0)),   # row tile, resident across j
                    pl.BlockSpec((D1, tn), lambda i, j: (0, j)),   # weight N-tile (streamed)
                ],
                out_specs=pl.BlockSpec((tm, tn), lambda i, j: (i, j)),
                # Cached normalized rows, in the weight dtype (bf16 fast path if bf16).
                scratch_shapes=[pltpu.VMEM((tm, D1), wt.dtype)],
            ),
            compiler_params=pltpu.CompilerParams(
                # j must stay "arbitrary": the pl.when(j==0)-initialized scratch would be
                # read uninitialized if megacore sharded j across TensorCores.
                dimension_semantics=("parallel", "arbitrary"),
                vmem_limit_bytes=vmem_limit_bytes,
            ),
            cost_estimate=pl.CostEstimate(flops=flops, transcendentals=transcendentals,
                                          bytes_accessed=bytes_accessed),
        )(x_p, wt_p)
    else:  # "w_resident": weight streamed once, x re-streamed per N-tile.
        bytes_accessed = nn * Mp * D1 * xb + D1 * D2p * wb + out_bytes
        out = pl.pallas_call(
            ln_linear_kernel_stream_x,
            out_shape=jax.ShapeDtypeStruct((Mp, D2p), x.dtype),
            grid_spec=pltpu.PrefetchScalarGridSpec(
                num_scalar_prefetch=0,
                grid=(nn, nm),                                      # j outer, i inner
                in_specs=[
                    pl.BlockSpec((tm, D1), lambda j, i: (i, 0)),    # x tile (streamed)
                    pl.BlockSpec((D1, tn), lambda j, i: (0, j)),    # weight tile, resident across i
                ],
                out_specs=pl.BlockSpec((tm, tn), lambda j, i: (i, j)),
            ),
            compiler_params=pltpu.CompilerParams(
                dimension_semantics=("parallel", "parallel"),       # no carried state here
                vmem_limit_bytes=vmem_limit_bytes,
            ),
            cost_estimate=pl.CostEstimate(flops=flops, transcendentals=transcendentals,
                                          bytes_accessed=bytes_accessed),
        )(x_p, wt_p)

    if Mp != M or D2p != D2:
        out = out[:M, :D2]
    return out


def prepare_ln_linear_weight(weight, *, dtype=None):
    """Pre-transpose the PyTorch Linear weight [D2, D1] -> [D1, D2] ONCE at
    parameter-init time.  Pass dtype=jnp.bfloat16 to also store it in bf16: that halves
    the streamed weight bytes (the dominant HBM traffic) and takes the MXU bf16 fast
    path; accumulation in the kernel is always f32."""
    wt = jnp.asarray(weight).T
    if dtype is not None:
        wt = wt.astype(dtype)
    return wt


def ln_linear_from_torch_weight(x, weight):
    """Convenience entry matching the PyTorch parameter layout weight=[D2, D1].
    Note: this pays a one-off transpose per call; prefer prepare_ln_linear_weight()."""
    return ln_linear(x, jnp.asarray(weight).T)


def ln_linear_ref(x, weight):
    x32 = x.astype(jnp.float32)
    xn = _ln_rows_f32(x32)
    return (xn @ weight.T.astype(jnp.float32)).astype(x.dtype)


if __name__ == "__main__":
    fc_dim1, fc_dim2 = 32, 64
    batch = 16

    key = jax.random.PRNGKey(0)
    kx, kw = jax.random.split(key)
    x = jax.random.normal(kx, (batch, fc_dim1), dtype=jnp.float32)
    # Deterministic init mimicking nn.Linear's kaiming-uniform bound (1/sqrt(fan_in))
    bound = 1.0 / (fc_dim1 ** 0.5)
    weight = jax.random.uniform(kw, (fc_dim2, fc_dim1), dtype=jnp.float32,
                                minval=-bound, maxval=bound)

    ref = ln_linear_ref(x, weight)

    # f32 weights, default (auto) grid order: exact check vs reference.
    wt = prepare_ln_linear_weight(weight)                  # pre-transposed once
    out = jax.block_until_ready(ln_linear(x, wt))
    assert out.shape == (batch, fc_dim2)
    assert jnp.allclose(out, ref, atol=1e-5, rtol=1e-5)

    # Weight-resident grid order path (exercised explicitly).
    out_wres = jax.block_until_ready(ln_linear(x, wt, grid_order="w_resident"))
    assert jnp.allclose(out_wres, ref, atol=1e-5, rtol=1e-5)

    # Recommended param-init storage: bf16 weight (bf16 MXU fast path, half the bytes).
    wt_bf16 = prepare_ln_linear_weight(weight, dtype=jnp.bfloat16)
    out_bf16 = jax.block_until_ready(ln_linear(x, wt_bf16))
    xn_f32 = _ln_rows_f32(x.astype(jnp.float32))
    ref_bf16 = (xn_f32.astype(jnp.bfloat16).astype(jnp.float32)
                @ wt_bf16.astype(jnp.float32))
    assert jnp.allclose(out_bf16, ref_bf16, atol=2e-2, rtol=2e-2)

    print("KERNEL_OK")
</pallas_src>

<mosaic_0001>
module attributes {stable_mosaic.version = 11 : i64} {
  func.func @ln_linear_kernel_cached(%arg0: i32, %arg1: i32, %arg2: memref<16x32xf32, #tpu.memory_space<vmem>>, %arg3: memref<32x128xf32, #tpu.memory_space<vmem>>, %arg4: memref<16x128xf32, #tpu.memory_space<vmem>>, %arg5: memref<16x32xf32, #tpu.memory_space<vmem>>) attributes {dimension_semantics = [#tpu.dimension_semantics<parallel>, #tpu.dimension_semantics<arbitrary>], iteration_bounds = array<i64: 1, 1>, scalar_prefetch = 0 : i64, scratch_operands = 1 : i64, tpu.core_type = #tpu.core_type<tc>, window_params = [{transform_indices = @transform_0, window_bounds = array<i64: 16, 32>}, {transform_indices = @transform_1, window_bounds = array<i64: 32, 128>}, {transform_indices = @transform_2, window_bounds = array<i64: 16, 128>}]} {
    %c0_i32 = arith.constant 0 : i32
    %0 = arith.cmpi eq, %arg1, %c0_i32 : i32
    %1 = arith.extui %0 : i1 to i32
    %c0_i32_0 = arith.constant 0 : i32
    %2 = arith.cmpi ne, %1, %c0_i32_0 : i32
    scf.if %2 {
      %c0_6 = arith.constant 0 : index
      %c0_7 = arith.constant 0 : index
      %7 = vector.load %arg2[%c0_6, %c0_7] : memref<16x32xf32, #tpu.memory_space<vmem>>, vector<16x32xf32>
      %cst_8 = arith.constant dense<0.000000e+00> : vector<16xf32>
      %8 = vector.multi_reduction <add>, %7, %cst_8 [1] : vector<16x32xf32> to vector<16xf32>
      %9 = vector.shape_cast %8 : vector<16xf32> to vector<16x1xf32>
      %cst_9 = arith.constant 3.200000e+01 : f32
      %10 = vector.broadcast %cst_9 : f32 to vector<16x1xf32>
      %11 = arith.divf %9, %10 : vector<16x1xf32>
      %12 = vector.broadcast %11 : vector<16x1xf32> to vector<16x32xf32>
      %13 = arith.subf %7, %12 : vector<16x32xf32>
      %14 = arith.mulf %13, %13 : vector<16x32xf32>
      %cst_10 = arith.constant dense<0.000000e+00> : vector<16xf32>
      %15 = vector.multi_reduction <add>, %14, %cst_10 [1] : vector<16x32xf32> to vector<16xf32>
      %16 = vector.shape_cast %15 : vector<16xf32> to vector<16x1xf32>
      %cst_11 = arith.constant 3.200000e+01 : f32
      %17 = vector.broadcast %cst_11 : f32 to vector<16x1xf32>
      %18 = arith.divf %16, %17 : vector<16x1xf32>
      %cst_12 = arith.constant 9.99999974E-6 : f32
      %19 = vector.broadcast %cst_12 : f32 to vector<16x1xf32>
      %20 = arith.addf %18, %19 : vector<16x1xf32>
      %21 = math.rsqrt %20 : vector<16x1xf32>
      %22 = vector.broadcast %21 : vector<16x1xf32> to vector<16x32xf32>
      %23 = arith.mulf %13, %22 : vector<16x32xf32>
      %c0_13 = arith.constant 0 : index
      %c0_14 = arith.constant 0 : index
      %24 = vector.load %arg5[%c0_13, %c0_14] : memref<16x32xf32, #tpu.memory_space<vmem>>, vector<16x32xf32>
      tpu.vector_store %arg5[%c0_13, %c0_14], %23 {strides = array<i32>} : memref<16x32xf32, #tpu.memory_space<vmem>>, vector<16x32xf32>,
    } else {
    }
    %c0 = arith.constant 0 : index
    %c0_1 = arith.constant 0 : index
    %3 = vector.load %arg5[%c0, %c0_1] : memref<16x32xf32, #tpu.memory_space<vmem>>, vector<16x32xf32>
    %c0_2 = arith.constant 0 : index
    %c0_3 = arith.constant 0 : index
    %4 = vector.load %arg3[%c0_2, %c0_3] : memref<32x128xf32, #tpu.memory_space<vmem>>, vector<32x128xf32>
    %cst = arith.constant dense<0.000000e+00> : vector<16x128xf32>
    %5 = tpu.matmul %3, %4, %cst {dimension_numbers = #tpu.dot_dimension_numbers<[1], [0], [0], [1], [0, 0, 1, 1], [], []>} : vector<16x32xf32>, vector<32x128xf32>, vector<16x128xf32> -> vector<16x128xf32>
    %c0_4 = arith.constant 0 : index
    %c0_5 = arith.constant 0 : index
    %6 = vector.load %arg4[%c0_4, %c0_5] : memref<16x128xf32, #tpu.memory_space<vmem>>, vector<16x128xf32>
    tpu.vector_store %arg4[%c0_4, %c0_5], %5 {strides = array<i32>} : memref<16x128xf32, #tpu.memory_space<vmem>>, vector<16x128xf32>,
    return
  }
  func.func @transform_0(%arg0: i32, %arg1: i32) -> (i32, i32) {
    %c0_i32 = arith.constant 0 : i32
    %c0_i32_0 = arith.constant 0 : i32
    return %arg0, %c0_i32 : i32, i32
  }
  func.func @transform_1(%arg0: i32, %arg1: i32) -> (i32, i32) {
    %c0_i32 = arith.constant 0 : i32
    %c0_i32_0 = arith.constant 0 : i32
    return %c0_i32, %arg1 : i32, i32
  }
  func.func @transform_2(%arg0: i32, %arg1: i32) -> (i32, i32) {
    %c0_i32 = arith.constant 0 : i32
    return %arg0, %arg1 : i32, i32
  }
}

</mosaic_0001>

<bundles_post_ra>
// kernel: tpu_custom_call.1
= control target key start
LH: loop header
LB: loop body
LE: loop exit
PB: predicated region body
PF: predicated region fallthrough
CT: control target
= control target key end

     0   :  { %7 = vsyncpa [#allocation4], 0  ;;  %s365_s0 = inlined_call_operand.hbm [shape: f32[16,32], index: 0, kind: input, shape index: {}]   ;;  %s366_s1 = inlined_call_operand.hbm [shape: f32[32,128], index: 1, kind: input, shape index: {}]   ;;  %s367_s2 = inlined_call_operand.hbm [shape: f32[16,128], index: 2, kind: output, shape index: {}]  }
   0x1   :  { %8 = vsyncpa [#allocation7], 0 }
   0x2   :  { %9 = vsyncpa [#allocation5], 0  ;;  %s292_s9 = smov [#allocation3]   ;;  %s220_s13 = scalar_lea.hbm %s365_s0, 256 }
   0x3   :  { %s15_s10 = sshll.u32 %s292_s9, 4  ;;  %p221_p0 = scmp.ne.s32.totalorder %s365_s0, %s220_s13  ;;  %s16_s10 = int_to_ptr.vmem [resolvable:$true] %s15_s10 }
   0x4   :  { %p224_p1 = scmp.lt.u32.totalorder %s220_s13, %s365_s0 }
   0x6   :  { %p226_p2 = pnand %p224_p1, %p221_p0 }
   0x8   :  { %229 = shalt.err (!%p226_p2)
}
   0x9   :  { %s230_s18 = scalar_lea.vmem %s16_s10, 256  ;;  %p235_p4 = scmp.lt.s32.totalorder %s16_s10, %s16_s10 }
   0xa   :  { %p231_p3 = scmp.ne.s32.totalorder %s16_s10, %s230_s18  ;;  %p236_p5 = scmp.lt.s32.totalorder %s230_s18, %s230_s18 }
   0xc   :  { %p237_p6 = por %p236_p5, %p235_p4 }
   0xe   :  { %p238_p7 = pnand %p237_p6, %p231_p3 }
  0x10   :  { %241 = shalt.err (!%p238_p7)
}
  0x11   :  { %s293_s19 = smov 128   ;;  %s294_s20 = smov 8  }
  0x12   :  { %21 = dma.hbm_to_vmem [thread:$0]  %s365_s0, 256, %s16_s10, [#allocation4], %s293_s19, %s293_s19, %s294_s20  }
  0x13   :  { %s295_s23 = smov [#allocation6]   ;;  %s242_s27 = scalar_lea.hbm %s366_s1, 512 }
  0x14   :  { %s27_s24 = sshll.u32 %s295_s23, 4  ;;  %p243_p8 = scmp.ne.s32.totalorder %s366_s1, %s242_s27  ;;  %s28_s24 = int_to_ptr.vmem [resolvable:$true] %s27_s24 }
  0x15   :  { %p246_p9 = scmp.lt.u32.totalorder %s242_s27, %s366_s1 }
  0x17   :  { %p248_p10 = pnand %p246_p9, %p243_p8 }
  0x19   :  { %251 = shalt.err (!%p248_p10)
}
  0x1a   :  { %s252_s4 = scalar_lea.vmem %s28_s24, 512  ;;  %p257_p12 = scmp.lt.s32.totalorder %s28_s24, %s28_s24 }
  0x1b   :  { %p253_p11 = scmp.ne.s32.totalorder %s28_s24, %s252_s4  ;;  %p258_p13 = scmp.lt.s32.totalorder %s252_s4, %s252_s4 }
  0x1d   :  { %p259_p0 = por %p258_p13, %p257_p12 }
  0x1f   :  { %p260_p1 = pnand %p259_p0, %p253_p11 }
  0x21   :  { %263 = shalt.err (!%p260_p1)
}
  0x22   :  { %33 = dma.hbm_to_vmem [thread:$0]  %s366_s1, 512, %s28_s24, [#allocation7], %s293_s19, %s293_s19, %s294_s20  }
  0x23   :  { %286 = dma.done.wait [#allocation4], 256  }
  0x24   :  { %287 = vsyncadd [#allocation4], 4294967040 }
  0x25   :  { %288 = dma.done.wait [#allocation7], 512  }
  0x26   :  { %289 = vsyncadd [#allocation7], 4294966784  ;;  %vm46_vm0 = vcmask 261120   ;;  %v44_v0 = vld [vmem:[#allocation3] sm:$0xff]  ;;  %v45_v1 = vld [vmem:[#allocation3 + $0x8] sm:$0xff]  ;;  %s296_s1 = smov [#allocation8]  }
  0x27   :  { %v47_v2 = vsel %vm46_vm0, %v44_v0, 0.0  ;;  %v50_v3 = vsel %vm46_vm0, %v45_v1, 0.0  ;;  %v78_v14 = vld [vmem:[#allocation6] sm:$0xff]  ;;  %v79_v15 = vld [vmem:[#allocation6 + $0x8] sm:$0xff]  ;;  %v80_v17 = vld [vmem:[#allocation6 + $0x10] sm:$0xff]  ;;  %s171_s6 = sshll.u32 %s296_s1, 4  ;;  %s172_s6 = int_to_ptr.vmem [resolvable:$true] %s171_s6 }
  0x28   :  { %48 = vadd.xlane.f32.xlu0 %v47_v2  ;;  %v203_v16 = vpack.c.bf16 %v79_v15, %v78_v14  ;;  %v81_v18 = vld [vmem:[#allocation6 + $0x18] sm:$0xff]  ;;  %s264_s7 = scalar_lea.vmem %s172_s6, 256  ;;  %p269_p3 = scmp.lt.s32.totalorder %s172_s6, %s172_s6 }
  0x29   :  { %v207_v19 = vpack.c.bf16 %v81_v18, %v80_v17  ;;  %p265_p2 = scmp.ne.s32.totalorder %s172_s6, %s264_s7  ;;  %p270_p4 = scmp.lt.s32.totalorder %s264_s7, %s264_s7 }
  0x2a   :  { %204 = vmatprep.subr.bf16.mxu0 %v203_v16 }
  0x2b   :  { %206 = vmatpush3.bf16.msra.mxu0 %v203_v16  ;;  %p271_p5 = por %p270_p4, %p269_p3 }
  0x2c   :  { %51 = vadd.xlane.f32.xlu0 %v50_v3  ;;  %208 = vmatprep.subr.bf16.mxu0 %v207_v19 }
  0x2d   :  { %p272_p6 = pnand %p271_p5, %p265_p2 }
  0x2f   :  { %210 = vmatpush3.bf16.msra.mxu0 %v207_v19 }
  0xb5   :  { %v49_v4 = vpop.xlane.xlu0 %48 }
  0xb6   :  { %v54_v5 = vmul.f32 0.03125, %v49_v4 }
  0xb8   :  { %v56_v6 = vsub.f32 %v44_v0, %v54_v5 }
  0xb9   :  { %v52_v7 = vpop.xlane.xlu0 %51 }
  0xba   :  { %v55_v8 = vmul.f32 0.03125, %v52_v7  ;;  %v58_v9 = vmul.f32 %v56_v6, %v56_v6 }
  0xbc   :  { %v57_v10 = vsub.f32 %v45_v1, %v55_v8  ;;  %v60_v11 = vsel %vm46_vm0, %v58_v9, 0.0 }
  0xbd   :  { %61 = vadd.xlane.f32.xlu1 %v60_v11 }
  0xbe   :  { %v59_v12 = vmul.f32 %v57_v10, %v57_v10 }
  0xc0   :  { %v63_v13 = vsel %vm46_vm0, %v59_v12, 0.0 }
  0xc1   :  { %64 = vadd.xlane.f32.xlu1 %v63_v13 }
 0x14a   :  { %v62_v20 = vpop.xlane.xlu1 %61 }
 0x14b   :  { %v66_v21 = vmul.f32 0.03125, %v62_v20 }
 0x14d   :  { %v68_v22 = vadd.f32 1e-05, %v66_v21 }
 0x14e   :  { %v65_v23 = vpop.xlane.xlu1 %64 }
 0x14f   :  { %216 = vrsqrt.f32 %v68_v22  ;;  %v67_v24 = vmul.f32 0.03125, %v65_v23 }
 0x151   :  { %v69_v25 = vadd.f32 1e-05, %v67_v24 }
 0x153   :  { %218 = vrsqrt.f32 %v69_v25 }
 0x159   :  { %v217_v26 = vpop.eup %216 }
 0x15a   :  { %v72_v27 = vmul.f32 %v217_v26, %v56_v6 }
 0x15c   :  { %74 = vst.msk [vmem:[#allocation2] sm:$0xff] %vm46_vm0, %v72_v27 }
 0x15d   :  { %v219_v28 = vpop.eup %218 }
 0x15e   :  { %v73_v29 = vmul.f32 %v219_v28, %v57_v10 }
 0x160   :  { %75 = vst.msk [vmem:[#allocation2 + $0x8] sm:$0xff] %vm46_vm0, %v73_v29 }
 0x163   :  { %v76_v30 = vld [vmem:[#allocation2] sm:$0xff] }
 0x164   :  { %200 = vmatprep.mubr.msk.f32.mxu0 %vm46_vm0, %v76_v30 }
 0x167   :  { %v77_v31 = vld [vmem:[#allocation2 + $0x8] sm:$0xff] }
 0x168   :  { %201 = vmatmul.mubr.msk.f32.vlgmr.msra.gmra.mrb[0].mxu0 %vm46_vm0, %v77_v31 }
 0x23b   :  { %v202_v32 = vpop.f32.mrb[0].mxu0 }
 0x23c   :  { %165 = vst [vmem:[#allocation8 + $0x8] sm:$0xff] %v202_v32  ;;  %v155_v33 = vpop.f32.mrb[1].mxu0 }
 0x23d   :  { %164 = vst [vmem:[#allocation8] sm:$0xff] %v155_v33 }
 0x23e   :  { %275 = shalt.err (!%p272_p6)
}
 0x23f   :  { %s276_s10 = scalar_lea.hbm %s367_s2, 256 }
 0x240   :  { %p277_p7 = scmp.ne.s32.totalorder %s367_s2, %s276_s10  ;;  %p280_p8 = scmp.lt.u32.totalorder %s276_s10, %s367_s2 }
 0x242   :  { %p282_p9 = pnand %p280_p8, %p277_p7 }
 0x244   :  { %285 = shalt.err (!%p282_p9)
}
 0x245   :  { %177 = dma.vmem_to_hbm [thread:$0]  %s172_s6, 256, %s367_s2, [#allocation5], %s293_s19, %s293_s19, %s294_s20  }
 0x246   :  { %290 = dma.done.wait [#allocation5], 256  }
 0x247   :  { %291 = vsyncadd [#allocation5], 4294967040 }
 0x248   :  { %181 = vsyncpa [#allocation4], 1 }
 0x249   :  { %182 = vsyncpa [#allocation7], 1 }
 0x24a   :  { %183 = vsyncpa [#allocation5], 1 }

</bundles_post_ra>
